<compile_context>
chip_gen: v6e
topology: v6e:2x2x1
jax: 0.10.0
libtpu: 0.0.40
codegen_flags: <defaults>
</compile_context>

<pallas_src>
import functools

import numpy as np

import jax
import jax.numpy as jnp
from jax.experimental import pallas as pl
from jax.experimental.pallas import tpu as pltpu


# ----------------------------- config ---------------------------------------
class Config:
    scale_weighted_sum = True
    loc_weighted_sum = True
    use_loc_emb = True
    mb_emb_dim = 32          # D
    num_bias = 5             # K
    multibias_trainable = True
    base_bias = 10.0
    scales = None            # -> [base_bias**i for i in range(-2, 3)]
    locs = [-1.0, 0.0, 1.0]  # J = 3


EPS = 1e-6       # eps used inside the PyTorch forward
LN_EPS = 1e-5    # nn.LayerNorm default eps (elementwise_affine=False)


def _round_up(v, m):
    return ((v + m - 1) // m) * m


# ----------------------------- kernel ----------------------------------------
def _mb_kernel(x_ref, pt_ref, cols_ref, out_ref, coeff_ref, *,
               locs, num_bias, scale_weighted_sum, loc_weighted_sum,
               use_loc_emb):
    """One (b, c) row x one L tile.

    x_ref:     (1, 1, TL)     input values, L on lanes
    pt_ref:    (D, CC_pad)    transposed stacked (centered) parameter matrix
    cols_ref:  (4, K, 1)      per-scale columns: [1/scale, Var(w), 2Cov(w,c), Var(c)]
    out_ref:   (1, D, TL)     encoded output (embedding on sublanes, L on lanes)
    coeff_ref: (CC_pad, TL)   VMEM scratch: per-element coefficient matrix
    """
    K = num_bias
    J = len(locs)
    KJ = K * J

    x = x_ref[0]                        # (1, TL)
    tl = x.shape[-1]

    # Hoisted lane-broadcasts of the per-scale columns (reused for every loc).
    inv_scale = jnp.broadcast_to(cols_ref[0], (K, tl))   # 1 / scale_k
    var_w = jnp.broadcast_to(cols_ref[1], (K, tl))       # Var_D(ws_k)
    cov2 = jnp.broadcast_to(cols_ref[2], (K, tl))        # 2 * Cov_D(ws_k, c_k)
    var_c = jnp.broadcast_to(cols_ref[3], (K, tl))       # Var_D(c_k)

    u_list, dis_list, lw_list = [], [], []
    for j in range(J):                                   # static unroll, J small
        dis = x - locs[j]                                # (1, TL)
        abs_dis = jnp.abs(dis)                           # reused for sw and loc_w

        # Analytic LayerNorm inverse std for all K scales at once.
        q = (dis * dis) * var_w + dis * cov2 + var_c     # (K, TL)
        r = jax.lax.rsqrt(jnp.maximum(q, 0.0) + LN_EPS)  # (K, TL)

        u = r
        if scale_weighted_sum:
            sw = 1.0 / (jnp.abs(jnp.log(abs_dis * inv_scale + EPS)) + EPS)  # (K, TL)
            inv_ssum = 1.0 / jnp.sum(sw, axis=0, keepdims=True)             # (1, TL)
            u = u * (sw * inv_ssum)
        if loc_weighted_sum:
            lw_list.append(1.0 / (jnp.log(abs_dis + 1.0) + EPS))            # (1, TL)

        u_list.append(u)
        dis_list.append(dis)

    if loc_weighted_sum:
        lsum = lw_list[0]
        for j in range(1, J):
            lsum = lsum + lw_list[j]
        inv_lsum = 1.0 / lsum                            # one reciprocal, J mults
        g_list = [lw * inv_lsum for lw in lw_list]       # normalized loc weights
    else:
        g_list = [None] * J

    # Coefficient matrix rows (must match the wrapper's parameter stacking):
    #   [     0,   K*J): t_jk * dis_j   <->  ws_k - mean(ws_k)
    #   [   K*J, 2*K*J): t_jk           <->  c_k  - mean(c_k)
    #   [ 2*K*J,    +J): loc weights    <->  loc_emb_j        (if use_loc_emb)
    #   remaining rows : zeros          <->  zero-padded pt columns
    for j in range(J):
        t = u_list[j] if g_list[j] is None else u_list[j] * g_list[j]       # (K, TL)
        coeff_ref[j * K:(j + 1) * K, :] = t * dis_list[j]
        coeff_ref[KJ + j * K:KJ + (j + 1) * K, :] = t

    rows = 2 * KJ
    if use_loc_emb:
        for j in range(J):
            if g_list[j] is None:
                coeff_ref[rows + j:rows + j + 1, :] = jnp.ones((1, tl), jnp.float32)
            else:
                coeff_ref[rows + j:rows + j + 1, :] = g_list[j]
        rows += J

    cc_pad = coeff_ref.shape[0]
    if cc_pad > rows:
        coeff_ref[rows:cc_pad, :] = jnp.zeros((cc_pad - rows, tl), jnp.float32)

    # Single MXU matmul does the whole (embedding x lane) combine.
    out = jnp.dot(pt_ref[...], coeff_ref[...],
                  preferred_element_type=jnp.float32)    # (D, TL)
    out_ref[...] = out[None]


# ----------------------------- wrapper ---------------------------------------
def multibias_encoder_wrapper(x, ws, bs, loc_emb, *, scales, locs, cfg,
                              max_lane_tile=4096):
    """Full MultiBiasEncoderWrapper forward: x (B, C, L) -> (B, C*D, L)."""
    B, C, L = x.shape
    D = cfg.mb_emb_dim
    K = int(ws.shape[0])
    J = len(locs)
    NR = B * C
    f32 = jnp.float32

    # ---- precompute parameter-side constants (tiny, plain JAX) ----
    scales_arr = jnp.asarray(scales, f32)                     # (K,)
    ws_f = ws.astype(f32)
    c = bs.astype(f32) * scales_arr[:, None]                  # (K, D)  bs_k * scale_k
    wc = ws_f - jnp.mean(ws_f, axis=1, keepdims=True)         # centered over D
    cc = c - jnp.mean(c, axis=1, keepdims=True)
    var_w = jnp.mean(wc * wc, axis=1)                         # (K,) biased, as LayerNorm
    var_c = jnp.mean(cc * cc, axis=1)
    cov = jnp.mean(wc * cc, axis=1)

    cols = jnp.stack([(1.0 / scales_arr)[:, None],
                      var_w[:, None],
                      (2.0 * cov)[:, None],
                      var_c[:, None]], axis=0)                # (4, K, 1)

    # Stacked parameter matrix P (rows match kernel coefficient rows), then P^T.
    blocks = [jnp.tile(wc, (J, 1)), jnp.tile(cc, (J, 1))]     # row a = j*K + k
    if cfg.use_loc_emb:
        blocks.append(loc_emb.astype(f32))
    p = jnp.concatenate(blocks, axis=0)                       # (CC, D)
    cc_rows = p.shape[0]
    cc_pad = _round_up(cc_rows, 8)
    if cc_pad != cc_rows:
        p = jnp.pad(p, ((0, cc_pad - cc_rows), (0, 0)))       # zero columns in P^T
    pt = p.T                                                  # (D, CC_pad)

    # ---- lane-dense input/output layout ----
    TL = min(max_lane_tile, _round_up(L, 128))
    L_pad = _round_up(L, TL)
    x3 = x.reshape(NR, 1, L).astype(f32)
    if L_pad != L:
        x3 = jnp.pad(x3, ((0, 0), (0, 0), (0, L_pad - L)))

    kernel = functools.partial(
        _mb_kernel,
        locs=tuple(float(v) for v in locs),
        num_bias=K,
        scale_weighted_sum=cfg.scale_weighted_sum,
        loc_weighted_sum=cfg.loc_weighted_sum,
        use_loc_emb=cfg.use_loc_emb,
    )

    out3 = pl.pallas_call(
        kernel,
        out_shape=jax.ShapeDtypeStruct((NR, D, L_pad), f32),
        grid_spec=pltpu.PrefetchScalarGridSpec(
            num_scalar_prefetch=0,
            grid=(NR, L_pad // TL),
            in_specs=[
                pl.BlockSpec((1, 1, TL), lambda r, t: (r, 0, t)),       # x row tile
                pl.BlockSpec((D, cc_pad), lambda r, t: (0, 0)),         # P^T (full)
                pl.BlockSpec((4, K, 1), lambda r, t: (0, 0, 0)),        # per-scale cols
            ],
            out_specs=pl.BlockSpec((1, D, TL), lambda r, t: (r, 0, t)),
            scratch_shapes=[pltpu.VMEM((cc_pad, TL), jnp.float32)],
        ),
        compiler_params=pltpu.CompilerParams(
            dimension_semantics=("parallel", "parallel")),
    )(x3, pt, cols)

    if L_pad != L:
        out3 = out3[:, :, :L]                                 # (B*C, D, L)
    # (B*C, D, L) is row-major identical to (B, C, D, L) -> (B, C*D, L):
    # the wrapper's transpose(2, 3) is absorbed by the kernel's output layout.
    return out3.reshape(B, C * D, L)


# ----------------------------- pure-JAX reference ----------------------------
def reference_forward(x, ws, bs, loc_emb, scales, locs, cfg):
    """Direct transcription of the PyTorch module (explicit LayerNorm)."""
    B, C, L = x.shape
    enc_x = x.reshape(B, -1)
    loc_dis = enc_x[..., None] - locs                              # (B, N, J)
    if cfg.loc_weighted_sum:
        loc_w = 1.0 / (jnp.log(jnp.abs(loc_dis) + 1.0) + EPS)
        loc_w = loc_w / loc_w.sum(axis=-1, keepdims=True)
    if cfg.scale_weighted_sum:
        scale_w = 1.0 / (jnp.abs(jnp.log(jnp.abs(loc_dis[..., None]) / scales + EPS)) + EPS)
        scale_w = scale_w / scale_w.sum(axis=-1, keepdims=True)
    y = loc_dis[..., None, None] * ws + bs * scales[:, None]       # (B, N, J, K, D)
    mu = jnp.mean(y, axis=-1, keepdims=True)
    var = jnp.mean((y - mu) ** 2, axis=-1, keepdims=True)
    y = (y - mu) * jax.lax.rsqrt(var + LN_EPS)
    if cfg.scale_weighted_sum:
        y = y * scale_w[..., None]
    y = y.sum(axis=-2)                                             # (B, N, J, D)
    if cfg.use_loc_emb:
        y = y + loc_emb
    if cfg.loc_weighted_sum:
        y = y * loc_w[..., None]
    y = y.sum(axis=-2)                                             # (B, N, D)
    D = cfg.mb_emb_dim
    return y.reshape(B, C, L, D).transpose(0, 1, 3, 2).reshape(B, C * D, L)


# ----------------------------- main -------------------------------------------
if __name__ == "__main__":
    cfg = Config()
    D = cfg.mb_emb_dim
    K = cfg.num_bias
    if cfg.scales is None:
        scales_list = [cfg.base_bias ** i
                       for i in range(-(K - 1) // 2, (K + 1) // 2)]
    else:
        scales_list = list(cfg.scales)
    locs_list = [0.0] if cfg.locs is None else list(cfg.locs)
    J = len(locs_list)

    key = jax.random.PRNGKey(0)
    k_ws, k_bs, k_le, k_x = jax.random.split(key, 4)
    # nn.init.uniform_(ws/bs, -1, 1)
    ws = jax.random.uniform(k_ws, (K, D), jnp.float32, minval=-1.0, maxval=1.0)
    bs = jax.random.uniform(k_bs, (K, D), jnp.float32, minval=-1.0, maxval=1.0)
    # trunc_normal_(loc_emb, std=0.02)
    loc_emb = 0.02 * jax.random.truncated_normal(k_le, -2.0, 2.0, (J, D), jnp.float32)

    B, C, L = 2, 4, 16
    x = 3.0 * jax.random.normal(k_x, (B, C, L), jnp.float32)

    out = multibias_encoder_wrapper(x, ws, bs, loc_emb,
                                    scales=scales_list, locs=locs_list, cfg=cfg)
    out = jax.block_until_ready(out)

    scales_arr = jnp.asarray(scales_list, jnp.float32)
    locs_arr = jnp.asarray(locs_list, jnp.float32)
    ref = reference_forward(x, ws, bs, loc_emb, scales_arr, locs_arr, cfg)
    ref = jax.block_until_ready(ref)

    assert out.shape == (B, C * D, L), out.shape
    np.testing.assert_allclose(np.asarray(out), np.asarray(ref),
                               rtol=2e-4, atol=2e-4)

    print("KERNEL_OK")
</pallas_src>

<mosaic_0001>
module attributes {stable_mosaic.version = 11 : i64} {
  func.func @_mb_kernel(%arg0: i32, %arg1: i32, %arg2: memref<1x1x128xf32, #tpu.memory_space<vmem>>, %arg3: memref<32x40xf32, #tpu.memory_space<vmem>>, %arg4: memref<4x5x1xf32, #tpu.memory_space<vmem>>, %arg5: memref<1x32x128xf32, #tpu.memory_space<vmem>>, %arg6: memref<40x128xf32, #tpu.memory_space<vmem>>) attributes {dimension_semantics = [#tpu.dimension_semantics<parallel>, #tpu.dimension_semantics<parallel>], iteration_bounds = array<i64: 8, 1>, scalar_prefetch = 0 : i64, scratch_operands = 1 : i64, tpu.core_type = #tpu.core_type<tc>, window_params = [{transform_indices = @transform_0, window_bounds = array<i64: 1, 1, 128>}, {pipeline_mode = #tpu.pipeline_mode<synchronous>, transform_indices = @transform_1, window_bounds = array<i64: 32, 40>}, {pipeline_mode = #tpu.pipeline_mode<synchronous>, transform_indices = @transform_2, window_bounds = array<i64: 4, 5, 1>}, {transform_indices = @transform_3, window_bounds = array<i64: 1, 32, 128>}]} {
    %c0 = arith.constant 0 : index
    %c0_0 = arith.constant 0 : index
    %c0_1 = arith.constant 0 : index
    %0 = vector.load %arg2[%c0, %c0_0, %c0_1] : memref<1x1x128xf32, #tpu.memory_space<vmem>>, vector<1x1x128xf32>
    %1 = vector.shape_cast %0 : vector<1x1x128xf32> to vector<1x128xf32>
    %c0_2 = arith.constant 0 : index
    %c0_3 = arith.constant 0 : index
    %c0_4 = arith.constant 0 : index
    %2 = vector.load %arg4[%c0_2, %c0_3, %c0_4] : memref<4x5x1xf32, #tpu.memory_space<vmem>>, vector<1x5x1xf32>
    %3 = vector.shape_cast %2 : vector<1x5x1xf32> to vector<5x1xf32>
    %4 = vector.shape_cast %3 : vector<5x1xf32> to vector<5x1xf32>
    %5 = vector.broadcast %4 : vector<5x1xf32> to vector<5x128xf32>
    %c1 = arith.constant 1 : index
    %c0_5 = arith.constant 0 : index
    %c0_6 = arith.constant 0 : index
    %6 = vector.load %arg4[%c1, %c0_5, %c0_6] : memref<4x5x1xf32, #tpu.memory_space<vmem>>, vector<1x5x1xf32>
    %7 = vector.shape_cast %6 : vector<1x5x1xf32> to vector<5x1xf32>
    %8 = vector.shape_cast %7 : vector<5x1xf32> to vector<5x1xf32>
    %9 = vector.broadcast %8 : vector<5x1xf32> to vector<5x128xf32>
    %c2 = arith.constant 2 : index
    %c0_7 = arith.constant 0 : index
    %c0_8 = arith.constant 0 : index
    %10 = vector.load %arg4[%c2, %c0_7, %c0_8] : memref<4x5x1xf32, #tpu.memory_space<vmem>>, vector<1x5x1xf32>
    %11 = vector.shape_cast %10 : vector<1x5x1xf32> to vector<5x1xf32>
    %12 = vector.shape_cast %11 : vector<5x1xf32> to vector<5x1xf32>
    %13 = vector.broadcast %12 : vector<5x1xf32> to vector<5x128xf32>
    %c3 = arith.constant 3 : index
    %c0_9 = arith.constant 0 : index
    %c0_10 = arith.constant 0 : index
    %14 = vector.load %arg4[%c3, %c0_9, %c0_10] : memref<4x5x1xf32, #tpu.memory_space<vmem>>, vector<1x5x1xf32>
    %15 = vector.shape_cast %14 : vector<1x5x1xf32> to vector<5x1xf32>
    %16 = vector.shape_cast %15 : vector<5x1xf32> to vector<5x1xf32>
    %17 = vector.broadcast %16 : vector<5x1xf32> to vector<5x128xf32>
    %cst = arith.constant -1.000000e+00 : f32
    %18 = vector.broadcast %cst : f32 to vector<1x128xf32>
    %19 = arith.subf %1, %18 : vector<1x128xf32>
    %20 = math.absf %19 : vector<1x128xf32>
    %21 = arith.mulf %19, %19 : vector<1x128xf32>
    %22 = vector.broadcast %21 : vector<1x128xf32> to vector<5x128xf32>
    %23 = arith.mulf %22, %9 : vector<5x128xf32>
    %24 = vector.broadcast %19 : vector<1x128xf32> to vector<5x128xf32>
    %25 = arith.mulf %24, %13 : vector<5x128xf32>
    %26 = arith.addf %23, %25 : vector<5x128xf32>
    %27 = arith.addf %26, %17 : vector<5x128xf32>
    %cst_11 = arith.constant 0.000000e+00 : f32
    %28 = vector.broadcast %cst_11 : f32 to vector<5x128xf32>
    %29 = arith.maximumf %27, %28 : vector<5x128xf32>
    %cst_12 = arith.constant 9.99999974E-6 : f32
    %30 = vector.broadcast %cst_12 : f32 to vector<5x128xf32>
    %31 = arith.addf %29, %30 : vector<5x128xf32>
    %32 = math.rsqrt %31 : vector<5x128xf32>
    %33 = vector.broadcast %20 : vector<1x128xf32> to vector<5x128xf32>
    %34 = arith.mulf %33, %5 : vector<5x128xf32>
    %cst_13 = arith.constant 9.99999997E-7 : f32
    %35 = vector.broadcast %cst_13 : f32 to vector<5x128xf32>
    %36 = arith.addf %34, %35 : vector<5x128xf32>
    %37 = math.log %36 : vector<5x128xf32>
    %38 = math.absf %37 : vector<5x128xf32>
    %cst_14 = arith.constant 9.99999997E-7 : f32
    %39 = vector.broadcast %cst_14 : f32 to vector<5x128xf32>
    %40 = arith.addf %38, %39 : vector<5x128xf32>
    %cst_15 = arith.constant 1.000000e+00 : f32
    %41 = vector.broadcast %cst_15 : f32 to vector<5x128xf32>
    %42 = arith.divf %41, %40 : vector<5x128xf32>
    %cst_16 = arith.constant dense<0.000000e+00> : vector<128xf32>
    %43 = vector.multi_reduction <add>, %42, %cst_16 [0] : vector<5x128xf32> to vector<128xf32>
    %44 = vector.shape_cast %43 : vector<128xf32> to vector<1x128xf32>
    %cst_17 = arith.constant 1.000000e+00 : f32
    %45 = vector.broadcast %cst_17 : f32 to vector<1x128xf32>
    %46 = arith.divf %45, %44 : vector<1x128xf32>
    %47 = vector.broadcast %46 : vector<1x128xf32> to vector<5x128xf32>
    %48 = arith.mulf %42, %47 : vector<5x128xf32>
    %49 = arith.mulf %32, %48 : vector<5x128xf32>
    %cst_18 = arith.constant 1.000000e+00 : f32
    %50 = vector.broadcast %cst_18 : f32 to vector<1x128xf32>
    %51 = arith.addf %20, %50 : vector<1x128xf32>
    %52 = math.log %51 : vector<1x128xf32>
    %cst_19 = arith.constant 9.99999997E-7 : f32
    %53 = vector.broadcast %cst_19 : f32 to vector<1x128xf32>
    %54 = arith.addf %52, %53 : vector<1x128xf32>
    %cst_20 = arith.constant 1.000000e+00 : f32
    %55 = vector.broadcast %cst_20 : f32 to vector<1x128xf32>
    %56 = arith.divf %55, %54 : vector<1x128xf32>
    %cst_21 = arith.constant 0.000000e+00 : f32
    %57 = vector.broadcast %cst_21 : f32 to vector<1x128xf32>
    %58 = arith.subf %1, %57 : vector<1x128xf32>
    %59 = math.absf %58 : vector<1x128xf32>
    %60 = arith.mulf %58, %58 : vector<1x128xf32>
    %61 = vector.broadcast %60 : vector<1x128xf32> to vector<5x128xf32>
    %62 = arith.mulf %61, %9 : vector<5x128xf32>
    %63 = vector.broadcast %58 : vector<1x128xf32> to vector<5x128xf32>
    %64 = arith.mulf %63, %13 : vector<5x128xf32>
    %65 = arith.addf %62, %64 : vector<5x128xf32>
    %66 = arith.addf %65, %17 : vector<5x128xf32>
    %cst_22 = arith.constant 0.000000e+00 : f32
    %67 = vector.broadcast %cst_22 : f32 to vector<5x128xf32>
    %68 = arith.maximumf %66, %67 : vector<5x128xf32>
    %cst_23 = arith.constant 9.99999974E-6 : f32
    %69 = vector.broadcast %cst_23 : f32 to vector<5x128xf32>
    %70 = arith.addf %68, %69 : vector<5x128xf32>
    %71 = math.rsqrt %70 : vector<5x128xf32>
    %72 = vector.broadcast %59 : vector<1x128xf32> to vector<5x128xf32>
    %73 = arith.mulf %72, %5 : vector<5x128xf32>
    %cst_24 = arith.constant 9.99999997E-7 : f32
    %74 = vector.broadcast %cst_24 : f32 to vector<5x128xf32>
    %75 = arith.addf %73, %74 : vector<5x128xf32>
    %76 = math.log %75 : vector<5x128xf32>
    %77 = math.absf %76 : vector<5x128xf32>
    %cst_25 = arith.constant 9.99999997E-7 : f32
    %78 = vector.broadcast %cst_25 : f32 to vector<5x128xf32>
    %79 = arith.addf %77, %78 : vector<5x128xf32>
    %cst_26 = arith.constant 1.000000e+00 : f32
    %80 = vector.broadcast %cst_26 : f32 to vector<5x128xf32>
    %81 = arith.divf %80, %79 : vector<5x128xf32>
    %cst_27 = arith.constant dense<0.000000e+00> : vector<128xf32>
    %82 = vector.multi_reduction <add>, %81, %cst_27 [0] : vector<5x128xf32> to vector<128xf32>
    %83 = vector.shape_cast %82 : vector<128xf32> to vector<1x128xf32>
    %cst_28 = arith.constant 1.000000e+00 : f32
    %84 = vector.broadcast %cst_28 : f32 to vector<1x128xf32>
    %85 = arith.divf %84, %83 : vector<1x128xf32>
    %86 = vector.broadcast %85 : vector<1x128xf32> to vector<5x128xf32>
    %87 = arith.mulf %81, %86 : vector<5x128xf32>
    %88 = arith.mulf %71, %87 : vector<5x128xf32>
    %cst_29 = arith.constant 1.000000e+00 : f32
    %89 = vector.broadcast %cst_29 : f32 to vector<1x128xf32>
    %90 = arith.addf %59, %89 : vector<1x128xf32>
    %91 = math.log %90 : vector<1x128xf32>
    %cst_30 = arith.constant 9.99999997E-7 : f32
    %92 = vector.broadcast %cst_30 : f32 to vector<1x128xf32>
    %93 = arith.addf %91, %92 : vector<1x128xf32>
    %cst_31 = arith.constant 1.000000e+00 : f32
    %94 = vector.broadcast %cst_31 : f32 to vector<1x128xf32>
    %95 = arith.divf %94, %93 : vector<1x128xf32>
    %cst_32 = arith.constant 1.000000e+00 : f32
    %96 = vector.broadcast %cst_32 : f32 to vector<1x128xf32>
    %97 = arith.subf %1, %96 : vector<1x128xf32>
    %98 = math.absf %97 : vector<1x128xf32>
    %99 = arith.mulf %97, %97 : vector<1x128xf32>
    %100 = vector.broadcast %99 : vector<1x128xf32> to vector<5x128xf32>
    %101 = arith.mulf %100, %9 : vector<5x128xf32>
    %102 = vector.broadcast %97 : vector<1x128xf32> to vector<5x128xf32>
    %103 = arith.mulf %102, %13 : vector<5x128xf32>
    %104 = arith.addf %101, %103 : vector<5x128xf32>
    %105 = arith.addf %104, %17 : vector<5x128xf32>
    %cst_33 = arith.constant 0.000000e+00 : f32
    %106 = vector.broadcast %cst_33 : f32 to vector<5x128xf32>
    %107 = arith.maximumf %105, %106 : vector<5x128xf32>
    %cst_34 = arith.constant 9.99999974E-6 : f32
    %108 = vector.broadcast %cst_34 : f32 to vector<5x128xf32>
    %109 = arith.addf %107, %108 : vector<5x128xf32>
    %110 = math.rsqrt %109 : vector<5x128xf32>
    %111 = vector.broadcast %98 : vector<1x128xf32> to vector<5x128xf32>
    %112 = arith.mulf %111, %5 : vector<5x128xf32>
    %cst_35 = arith.constant 9.99999997E-7 : f32
    %113 = vector.broadcast %cst_35 : f32 to vector<5x128xf32>
    %114 = arith.addf %112, %113 : vector<5x128xf32>
    %115 = math.log %114 : vector<5x128xf32>
    %116 = math.absf %115 : vector<5x128xf32>
    %cst_36 = arith.constant 9.99999997E-7 : f32
    %117 = vector.broadcast %cst_36 : f32 to vector<5x128xf32>
    %118 = arith.addf %116, %117 : vector<5x128xf32>
    %cst_37 = arith.constant 1.000000e+00 : f32
    %119 = vector.broadcast %cst_37 : f32 to vector<5x128xf32>
    %120 = arith.divf %119, %118 : vector<5x128xf32>
    %cst_38 = arith.constant dense<0.000000e+00> : vector<128xf32>
    %121 = vector.multi_reduction <add>, %120, %cst_38 [0] : vector<5x128xf32> to vector<128xf32>
    %122 = vector.shape_cast %121 : vector<128xf32> to vector<1x128xf32>
    %cst_39 = arith.constant 1.000000e+00 : f32
    %123 = vector.broadcast %cst_39 : f32 to vector<1x128xf32>
    %124 = arith.divf %123, %122 : vector<1x128xf32>
    %125 = vector.broadcast %124 : vector<1x128xf32> to vector<5x128xf32>
    %126 = arith.mulf %120, %125 : vector<5x128xf32>
    %127 = arith.mulf %110, %126 : vector<5x128xf32>
    %cst_40 = arith.constant 1.000000e+00 : f32
    %128 = vector.broadcast %cst_40 : f32 to vector<1x128xf32>
    %129 = arith.addf %98, %128 : vector<1x128xf32>
    %130 = math.log %129 : vector<1x128xf32>
    %cst_41 = arith.constant 9.99999997E-7 : f32
    %131 = vector.broadcast %cst_41 : f32 to vector<1x128xf32>
    %132 = arith.addf %130, %131 : vector<1x128xf32>
    %cst_42 = arith.constant 1.000000e+00 : f32
    %133 = vector.broadcast %cst_42 : f32 to vector<1x128xf32>
    %134 = arith.divf %133, %132 : vector<1x128xf32>
    %135 = arith.addf %56, %95 : vector<1x128xf32>
    %136 = arith.addf %135, %134 : vector<1x128xf32>
    %cst_43 = arith.constant 1.000000e+00 : f32
    %137 = vector.broadcast %cst_43 : f32 to vector<1x128xf32>
    %138 = arith.divf %137, %136 : vector<1x128xf32>
    %139 = arith.mulf %56, %138 : vector<1x128xf32>
    %140 = arith.mulf %95, %138 : vector<1x128xf32>
    %141 = arith.mulf %134, %138 : vector<1x128xf32>
    %142 = vector.broadcast %139 : vector<1x128xf32> to vector<5x128xf32>
    %143 = arith.mulf %49, %142 : vector<5x128xf32>
    %144 = vector.broadcast %19 : vector<1x128xf32> to vector<5x128xf32>
    %145 = arith.mulf %143, %144 : vector<5x128xf32>
    %c0_44 = arith.constant 0 : index
    %c0_45 = arith.constant 0 : index
    %146 = vector.load %arg6[%c0_44, %c0_45] : memref<40x128xf32, #tpu.memory_space<vmem>>, vector<5x128xf32>
    tpu.vector_store %arg6[%c0_44, %c0_45], %145 {strides = array<i32>} : memref<40x128xf32, #tpu.memory_space<vmem>>, vector<5x128xf32>,
    %c15 = arith.constant 15 : index
    %c0_46 = arith.constant 0 : index
    %147 = vector.load %arg6[%c15, %c0_46] : memref<40x128xf32, #tpu.memory_space<vmem>>, vector<5x128xf32>
    tpu.vector_store %arg6[%c15, %c0_46], %143 {strides = array<i32>} : memref<40x128xf32, #tpu.memory_space<vmem>>, vector<5x128xf32>,
    %148 = vector.broadcast %140 : vector<1x128xf32> to vector<5x128xf32>
    %149 = arith.mulf %88, %148 : vector<5x128xf32>
    %150 = vector.broadcast %58 : vector<1x128xf32> to vector<5x128xf32>
    %151 = arith.mulf %149, %150 : vector<5x128xf32>
    %c5 = arith.constant 5 : index
    %c0_47 = arith.constant 0 : index
    %152 = vector.load %arg6[%c5, %c0_47] : memref<40x128xf32, #tpu.memory_space<vmem>>, vector<5x128xf32>
    tpu.vector_store %arg6[%c5, %c0_47], %151 {strides = array<i32>} : memref<40x128xf32, #tpu.memory_space<vmem>>, vector<5x128xf32>,
    %c20 = arith.constant 20 : index
    %c0_48 = arith.constant 0 : index
    %153 = vector.load %arg6[%c20, %c0_48] : memref<40x128xf32, #tpu.memory_space<vmem>>, vector<5x128xf32>
    tpu.vector_store %arg6[%c20, %c0_48], %149 {strides = array<i32>} : memref<40x128xf32, #tpu.memory_space<vmem>>, vector<5x128xf32>,
    %154 = vector.broadcast %141 : vector<1x128xf32> to vector<5x128xf32>
    %155 = arith.mulf %127, %154 : vector<5x128xf32>
    %156 = vector.broadcast %97 : vector<1x128xf32> to vector<5x128xf32>
    %157 = arith.mulf %155, %156 : vector<5x128xf32>
    %c10 = arith.constant 10 : index
    %c0_49 = arith.constant 0 : index
    %158 = vector.load %arg6[%c10, %c0_49] : memref<40x128xf32, #tpu.memory_space<vmem>>, vector<5x128xf32>
    tpu.vector_store %arg6[%c10, %c0_49], %157 {strides = array<i32>} : memref<40x128xf32, #tpu.memory_space<vmem>>, vector<5x128xf32>,
    %c25 = arith.constant 25 : index
    %c0_50 = arith.constant 0 : index
    %159 = vector.load %arg6[%c25, %c0_50] : memref<40x128xf32, #tpu.memory_space<vmem>>, vector<5x128xf32>
    tpu.vector_store %arg6[%c25, %c0_50], %155 {strides = array<i32>} : memref<40x128xf32, #tpu.memory_space<vmem>>, vector<5x128xf32>,
    %c30 = arith.constant 30 : index
    %c0_51 = arith.constant 0 : index
    %160 = vector.load %arg6[%c30, %c0_51] : memref<40x128xf32, #tpu.memory_space<vmem>>, vector<1x128xf32>
    tpu.vector_store %arg6[%c30, %c0_51], %139 {strides = array<i32>} : memref<40x128xf32, #tpu.memory_space<vmem>>, vector<1x128xf32>,
    %c31 = arith.constant 31 : index
    %c0_52 = arith.constant 0 : index
    %161 = vector.load %arg6[%c31, %c0_52] : memref<40x128xf32, #tpu.memory_space<vmem>>, vector<1x128xf32>
    tpu.vector_store %arg6[%c31, %c0_52], %140 {strides = array<i32>} : memref<40x128xf32, #tpu.memory_space<vmem>>, vector<1x128xf32>,
    %c32 = arith.constant 32 : index
    %c0_53 = arith.constant 0 : index
    %162 = vector.load %arg6[%c32, %c0_53] : memref<40x128xf32, #tpu.memory_space<vmem>>, vector<1x128xf32>
    tpu.vector_store %arg6[%c32, %c0_53], %141 {strides = array<i32>} : memref<40x128xf32, #tpu.memory_space<vmem>>, vector<1x128xf32>,
    %cst_54 = arith.constant 0.000000e+00 : f32
    %163 = vector.broadcast %cst_54 : f32 to vector<7x128xf32>
    %c33 = arith.constant 33 : index
    %c0_55 = arith.constant 0 : index
    %164 = vector.load %arg6[%c33, %c0_55] : memref<40x128xf32, #tpu.memory_space<vmem>>, vector<7x128xf32>
    tpu.vector_store %arg6[%c33, %c0_55], %163 {strides = array<i32>} : memref<40x128xf32, #tpu.memory_space<vmem>>, vector<7x128xf32>,
    %c0_56 = arith.constant 0 : index
    %c0_57 = arith.constant 0 : index
    %165 = vector.load %arg3[%c0_56, %c0_57] : memref<32x40xf32, #tpu.memory_space<vmem>>, vector<32x40xf32>
    %c0_58 = arith.constant 0 : index
    %c0_59 = arith.constant 0 : index
    %166 = vector.load %arg6[%c0_58, %c0_59] : memref<40x128xf32, #tpu.memory_space<vmem>>, vector<40x128xf32>
    %cst_60 = arith.constant dense<0.000000e+00> : vector<32x128xf32>
    %167 = tpu.matmul %165, %166, %cst_60 {dimension_numbers = #tpu.dot_dimension_numbers<[1], [0], [0], [1], [0, 0, 1, 1], [], []>} : vector<32x40xf32>, vector<40x128xf32>, vector<32x128xf32> -> vector<32x128xf32>
    %168 = vector.shape_cast %167 : vector<32x128xf32> to vector<1x32x128xf32>
    %c0_61 = arith.constant 0 : index
    %c0_62 = arith.constant 0 : index
    %c0_63 = arith.constant 0 : index
    %169 = vector.load %arg5[%c0_61, %c0_62, %c0_63] : memref<1x32x128xf32, #tpu.memory_space<vmem>>, vector<1x32x128xf32>
    tpu.vector_store %arg5[%c0_61, %c0_62, %c0_63], %168 {strides = array<i32>} : memref<1x32x128xf32, #tpu.memory_space<vmem>>, vector<1x32x128xf32>,
    return
  }
  func.func @transform_0(%arg0: i32, %arg1: i32) -> (i32, i32, i32) {
    %c0_i32 = arith.constant 0 : i32
    %c0_i32_0 = arith.constant 0 : i32
    return %arg0, %c0_i32, %arg1 : i32, i32, i32
  }
  func.func @transform_1(%arg0: i32, %arg1: i32) -> (i32, i32) {
    %c0_i32 = arith.constant 0 : i32
    %c0_i32_0 = arith.constant 0 : i32
    %c0_i32_1 = arith.constant 0 : i32
    return %c0_i32, %c0_i32_0 : i32, i32
  }
  func.func @transform_2(%arg0: i32, %arg1: i32) -> (i32, i32, i32) {
    %c0_i32 = arith.constant 0 : i32
    %c0_i32_0 = arith.constant 0 : i32
    %c0_i32_1 = arith.constant 0 : i32
    %c0_i32_2 = arith.constant 0 : i32
    return %c0_i32, %c0_i32_0, %c0_i32_1 : i32, i32, i32
  }
  func.func @transform_3(%arg0: i32, %arg1: i32) -> (i32, i32, i32) {
    %c0_i32 = arith.constant 0 : i32
    %c0_i32_0 = arith.constant 0 : i32
    return %arg0, %c0_i32, %arg1 : i32, i32, i32
  }
}

</mosaic_0001>

<bundles_post_ra>
// kernel: tpu_custom_call.1
= control target key start
LH: loop header
LB: loop body
LE: loop exit
PB: predicated region body
PF: predicated region fallthrough
CT: control target
= control target key end

     0   :  { %8 = vsyncpa [#allocation4], 0  ;;  %s1176_s0 = inlined_call_operand.hbm [shape: f32[8,1,128], index: 0, kind: input, shape index: {}]   ;;  %s1177_s1 = inlined_call_operand.vmem [shape: f32[32,40], index: 1, kind: input, shape index: {}]   ;;  %s1178_s2 = inlined_call_operand.vmem [shape: f32[4,5,1], index: 2, kind: input, shape index: {}]   ;;  %s1179_s3 = inlined_call_operand.hbm [shape: f32[8,32,128], index: 3, kind: output, shape index: {}]  }
   0x1   :  { %10 = vsyncpa [#allocation4 + $0x1], 0 }
   0x2   :  { %11 = vsyncpa [#allocation5], 0 }
   0x3   :  { %13 = vsyncpa [#allocation5 + $0x1], 0  ;;  %s934_s12 = smov 0   ;;  %s936_s13 = smov 0  }
   0x4   :  { %s938_s14 = smov 0   ;;  %s940_s15 = smov 0  }
   0x5   :  { %s942_s16 = smov 0   ;;  %s944_s17 = smov 0  }
   0x6 LB: > { %s635_s18 = sadd.s32 4294967295, %s906_s17   ;;  %s636_s19 = sadd.s32 4294967294, %s906_s17   ;;  %s906_s17 = sphi %s944_s17, %s19_s17   ;;  %s902_s16 = sphi %s942_s16, %s1190_s16   ;;  %s898_s15 = sphi %s940_s15, %s1189_s15   ;;  %s894_s14 = sphi %s938_s14, %s1188_s14   ;;  %s890_s13 = sphi %s936_s13, %s1187_s13   ;;  %s886_s12 = sphi %s934_s12, %s1186_s12  }
   0x7   : > { %s31_s20 = sadd.s32 1, %s902_s16  ;;  %s40_s21 = sadd.s32 1, %s894_s14 }
   0x8   : > { %p33_p0 = scmp.ge.s32.totalorder %s31_s20, 8  ;;  %p47_p1 = scmp.ne.s32.totalorder %s894_s14, %s890_s13 }
   0x9   : > { %p48_p2 = scmp.eq.s32.totalorder %s906_s17, 0  ;;  %p53_p3 = scmp.ne.s32.totalorder %s890_s13, %s886_s12 }
   0xa   : > { %s1192_s20 = smov (%p33_p0, %s31_s20), 0  ;;  %p54_p5 = scmp.eq.s32.totalorder %s635_s18, 0 }
   0xb   : > { %p975_p4 = por %p48_p2, %p47_p1  ;;  %s35_s23 = ssub.s32 %s902_s16, %s1192_s20 }
   0xc   : > { %p121_p6 = scmp.eq.s32.totalorder %s635_s18, 7  ;;  %p38_p7 = scmp.eq.s32.totalorder %s35_s23, 0 }
   0xd   : > { %p981_p8 = por %p54_p5, %p53_p3  ;;  %p127_p10 = scmp.eq.s32.totalorder %s636_s19, 7 }
   0xe   : > { %p985_p9 = por %p121_p6, %p47_p1  ;;  %p704_p12 = scmp.lt.s32.totalorder %s906_s17, 8 }
   0xf   : > { %s990_s26 = scalar_select %p38_p7, %s894_s14, %s40_s21  }
  0x10   : > { %p992_p11 = por %p127_p10, %p53_p3  ;;  %s153_s28 = sand.u32 1, %s894_s14  }
  0x11   : > { %s639_s29 = sshll.u32 %s902_s16, 4  ;;  %s156_s30 = scalar_lea.vmem [#allocation3], %s153_s28 }
  0x12   : > { %s1183_s27 = scalar_select %p992_p11, 1, 0 }
  0x13   : > { %s164_s4 = sshll.u32 %s156_s30, 4  ;;  %s162_s7 = scalar_lea.hbm %s1176_s0, %s639_s29  ;;  %s165_s4 = int_to_ptr.vmem [resolvable:$true] %s164_s4 }
  0x14   : > { %p1004_p13 = pnand %p704_p12, %p975_p4  ;;  %p640_p0 = scmp.ge.s32.totalorder %s906_s17, 1 }
  0x15   : > { %p169_p1 = scmp.lt.s32.totalorder %s906_s17, 9  ;;  %s154_s9 = scalar_lea.sflag [#allocation4], %s153_s28 }
  0x16   : > { %p800_p2 = pneg %p1004_p13  ;;  %s811_s10 = scalar_lea.vmem %s165_s4, 16 }
  0x17   : > { %p812_p3 = scmp.ne.s32.totalorder %s165_s4, %s811_s10  ;;  %s908_s11 = smov [#allocation3]  }
  0x18   : > { %s816_s18 = sshll.u32 %s908_s11, 4  ;;  %s817_s18 = int_to_ptr.vmem [resolvable:$false] %s816_s18 }
  0x19   : > { %p814_p5 = pnand %p812_p3, %p800_p2  ;;  %s818_s19 = scalar_lea.vmem %s817_s18, 32 }
  0x1a   : > { %p819_p7 = scmp.lt.s32.totalorder %s165_s4, %s817_s18  ;;  %p820_p10 = scmp.lt.s32.totalorder %s818_s19, %s811_s10 }
  0x1b   : > { %p815_p6 = pneg %p814_p5 }
  0x1c   : > { %p821_p4 = por %p820_p10, %p819_p7 }
  0x1e   : > { %p822_p12 = pnand %p821_p4, %p815_p6 }
  0x20   : > { %825 = shalt.err (!%p822_p12)
}
  0x21   : > { %699 = dma.hbm_to_vmem [thread:$0]  (!%p1004_p13), %s162_s7, 16, %s165_s4, %s154_s9  }
  0x22   : > { %p170_p11 = pnand %p640_p0, %p169_p1 }
  0x23   : > { %s1019_s21 = sand.u32 (!%p170_p11), 1, %s890_s13  }
  0x24   : > { %173 = sbr.rel (%p170_p11) target bundleno = 466 (0x1d2), region = 32  ;;  %s176_s22 = scalar_lea.sflag (!%p170_p11), [#allocation4], %s1019_s21 }
  0x25   : > { %s178_s23 = scalar_lea.vmem (!%p170_p11), [#allocation3], %s1019_s21 }
  0x29   : > { %877 = dma.done.wait (%p981_p8), %s176_s22, 16  }
  0x2a   : > { %879 = vsyncadd (%p981_p8), %s176_s22, 4294967280  ;;  %v909_v0 = vmov 0   ;;  %v201_v1 = vld [vmem:[%s1178_s2] sm:$0x1f]  ;;  %v643_v2 = vld [vmem:[%s1178_s2 + $0x10] sm:$0x1f]  ;;  %v232_v28 = vlaneseq }
  0x2b   : > { %758 = vset.pattern.permute.xlu0 %v909_v0  ;;  %759 = vset.pattern.permute.xlu1 %v909_v0  ;;  %v1033_v3 = vld [vmem:[%s178_s23] sm:$0x1]  ;;  %v642_v4 = vld [vmem:[%s1178_s2 + $0x8] sm:$0x1f]  ;;  %v644_v5 = vld [vmem:[%s1178_s2 + $0x18] sm:$0x1f] }
  0x2c   : > { %204 = vperm.xlu0 %758, %v201_v1   ;;  %218 = vperm.xlu1 %759, %v643_v2   ;;  %v1042_v6 = vadd.f32 1.0, %v1033_v3  ;;  %v1046_v8 = vadd.f32 -1.0, %v1033_v3  ;;  %v282_v9 = vand.u32 2147483647, %v1033_v3  ;;  %v233_v29 = vshrl.u32 %v232_v28, 7  ;;  %v428_v40 = vld [vmem:[%s1177_s1] sm:$0xff] }
  0x2d   : > { %v910_v38 = vmov 0.0   ;;  %vm437_vm0 = vcmask 326656   ;;  %v430_v41 = vld [vmem:[%s1177_s1 + $0x10] sm:$0xff]  ;;  %vm264_vm1 = vcmask 1044480   ;;  %s641_s28 = sshll.u32 %s1019_s21, 5  ;;  %s656_s4 = sshll.u32 %s898_s15, 9 }
  0x2e   : > { %v229_v7 = vand.u32 2147483647, %v1042_v6  ;;  %v328_v11 = vadd.f32 1.0, %v282_v9  ;;  %v335_v12 = vand.u32 2147483647, %v1046_v8  ;;  %v1050_v31 = vsub.s32 0, %v233_v29  ;;  %676 = vmatprep.mubr.msk.f32.mxu0 %vm437_vm0, %v428_v40  ;;  %679 = vmatprep.mubr.msk.f32.mxu1 %vm437_vm0, %v430_v41  ;;  %s1129_s24 = scalar_lea.hbm %s1179_s3, %s656_s4 }
  0x2f   : > { %427 = vst [vmem:[#allocation2 + $0x21] sm:$0x7f] %v910_v38  ;;  %v230_v62 = vmul.f32 %v1042_v6, %v1042_v6  ;;  %s199_s29 = scalar_lea.vmem [#allocation6], %s641_s28  ;;  %s540_s7 = scalar_lea.sflag [#allocation5], %s1019_s21 }
  0x30   : > { %211 = vperm.xlu0 %758, %v642_v4   ;;  %225 = vperm.xlu1 %759, %v644_v5   ;;  %v276_v10 = vadd.f32 1.0, %v229_v7  ;;  %v381_v13 = vadd.f32 1.0, %v335_v12  ;;  %v254_v42 = vrot.slane %v229_v7, %v1050_v31  ;;  %v307_v43 = vrot.slane %v282_v9, %v1050_v31  ;;  %s554_s30 = sshll.u32 %s199_s29, 4  ;;  %s911_s8 = smov [#allocation6]   ;;  %s1124_s30 = int_to_ptr.vmem [resolvable:$true] %s554_s30 }
  0x31   : > { %v360_v44 = vrot.slane %v335_v12, %v1050_v31  ;;  %v1082_v1 = vrot.slane %v1042_v6, %v1050_v31  ;;  %v235_v2 = vrot.slane %v230_v62, %v1050_v31  ;;  %v283_v4 = vmul.f32 %v1033_v3, %v1033_v3  ;;  %s826_s15 = scalar_lea.vmem %s1124_s30, 512  ;;  %s830_s9 = sshll.u32 %s911_s8, 4  ;;  %s831_s9 = int_to_ptr.vmem [resolvable:$false] %s830_s9 }
  0x32   : > { %760 = vlog2.f32 %v276_v10  ;;  %v336_v9 = vmul.f32 %v1046_v8, %v1046_v8  ;;  %p827_p8 = scmp.ne.s32.totalorder %s1124_s30, %s826_s15  ;;  %s832_s10 = scalar_lea.vmem %s831_s9, 1024 }
  0x33   : > { %762 = vlog2.f32 %v328_v11  ;;  %v1092_v11 = vrot.slane %v1033_v3, %v1050_v31  ;;  %v288_v6 = vrot.slane %v283_v4, %v1050_v31  ;;  %p833_p0 = scmp.lt.s32.totalorder %s1124_s30, %s831_s9  ;;  %p834_p1 = scmp.lt.s32.totalorder %s832_s10, %s826_s15 }
  0x34   : > { %764 = vlog2.f32 %v381_v13  ;;  %v1097_v13 = vrot.slane %v1046_v8, %v1050_v31  ;;  %p828_p11 = pnand %p827_p8, %p985_p9 }
  0x35   : > { %p835_p2 = por %p834_p1, %p833_p0 }
  0x36   : > { %p829_p13 = pneg %p828_p11 }
  0x38   : > { %p836_p3 = pnand %p835_p2, %p829_p13 }
  0x3f   : > { %v761_v14 = vpop.eup %760 }
  0x40   : > { %v763_v15 = vpop.eup %762  ;;  %v278_v16 = vmul.f32 0.6931472, %v761_v14  ;;  %v341_v14 = vrot.slane %v336_v9, %v1050_v31 }
  0x41   : > { %v330_v17 = vmul.f32 0.6931472, %v763_v15  ;;  %v765_v19 = vpop.eup %764 }
  0x42   : > { %v279_v18 = vadd.f32 1e-06, %v278_v16  ;;  %v383_v21 = vmul.f32 0.6931472, %v765_v19 }
  0x43   : > { %v331_v20 = vadd.f32 1e-06, %v330_v17 }
  0x44   : > { %766 = vrcp.f32 %v279_v18  ;;  %v384_v22 = vadd.f32 1e-06, %v383_v21 }
  0x45   : > { %768 = vrcp.f32 %v331_v20 }
  0x46   : > { %770 = vrcp.f32 %v384_v22 }
  0x51   : > { %v767_v23 = vpop.eup %766 }
  0x52   : > { %v769_v24 = vpop.eup %768 }
  0x53   : > { %v387_v25 = vadd.f32 %v769_v24, %v767_v23  ;;  %v771_v26 = vpop.eup %770 }
  0x55   : > { %v388_v27 = vadd.f32 %v771_v26, %v387_v25 }
  0x57   : > { %772 = vrcp.f32 %v388_v27 }
  0x64   : > { %v773_v30 = vpop.eup %772 }
  0x65   : > { %v1052_v32 = vmul.f32 %v773_v30, %v767_v23  ;;  %v1054_v33 = vmul.f32 %v773_v30, %v769_v24  ;;  %v1056_v34 = vmul.f32 %v773_v30, %v771_v26 }
  0x67   : > { %v398_v35 = vrot.slane %v1052_v32, %v1050_v31  ;;  %v408_v36 = vrot.slane %v1054_v33, %v1050_v31  ;;  %v418_v37 = vrot.slane %v1056_v34, %v1050_v31  ;;  %424 = vst [vmem:[#allocation2 + $0x1e] sm:$0x1] %v1052_v32  ;;  %425 = vst [vmem:[#allocation2 + $0x1f] sm:$0x1] %v1054_v33 }
  0x68   : > { %426 = vst [vmem:[#allocation2 + $0x20] sm:$0x1] %v1056_v34 }
  0x6f   : > { %v436_v39 = vld [vmem:[#allocation2 + $0x20] sm:$0xff] }
  0x70   : > { %666 = vmatprep.subr.mxu0 %v436_v39  ;;  %682 = vmatprep.subr.mxu1 %v436_v39 }
  0x71   : > { %667 = vmatpush3.msra.mxu0 %v436_v39  ;;  %687 = vmatpush3.msra.mxu1 %v436_v39 }
  0xa7   : > { %v205_v45 = vpop.permute.xlu0 %204  ;;  %v219_v5 = vpop.permute.xlu1 %218 }
  0xa8   : > { %v256_v46 = vmul.f32 %v254_v42, %v205_v45  ;;  %v309_v47 = vmul.f32 %v307_v43, %v205_v45  ;;  %v362_v48 = vmul.f32 %v360_v44, %v205_v45  ;;  %v244_v10 = vmul.f32 %v1082_v1, %v219_v5 }
  0xa9   : > { %v297_v15 = vmul.f32 %v1092_v11, %v219_v5  ;;  %v350_v18 = vmul.f32 %v1097_v13, %v219_v5 }
  0xaa   : > { %v257_v49 = vadd.f32 1e-06, %v256_v46  ;;  %v310_v50 = vadd.f32 1e-06, %v309_v47  ;;  %v363_v51 = vadd.f32 1e-06, %v362_v48 }
  0xab   : > { %v212_v7 = vpop.permute.xlu0 %211  ;;  %v226_v20 = vpop.permute.xlu1 %225 }
  0xac   : > { %774 = vlog2.f32 %v257_v49  ;;  %v237_v12 = vmul.f32 %v235_v2, %v212_v7  ;;  %v290_v16 = vmul.f32 %v288_v6, %v212_v7  ;;  %v343_v19 = vmul.f32 %v341_v14, %v212_v7 }
  0xad   : > { %776 = vlog2.f32 %v310_v50 }
  0xae   : > { %778 = vlog2.f32 %v363_v51  ;;  %v245_v17 = vadd.f32 %v244_v10, %v237_v12  ;;  %v298_v24 = vadd.f32 %v297_v15, %v290_v16  ;;  %v351_v27 = vadd.f32 %v350_v18, %v343_v19 }
  0xb0   : > { %v246_v23 = vadd.f32 %v245_v17, %v226_v20  ;;  %v299_v41 = vadd.f32 %v298_v24, %v226_v20  ;;  %v352_v44 = vadd.f32 %v351_v27, %v226_v20 }
  0xb2   : > { %v247_v40 = vmax.f32 %v246_v23, 0.0  ;;  %v300_v50 = vmax.f32 %v299_v41, 0.0 }
  0xb4   : > { %v248_v49 = vadd.f32 1e-05, %v247_v40 }
  0xb9   : > { %v775_v52 = vpop.eup %774 }
  0xba   : > { %v777_v53 = vpop.eup %776  ;;  %v259_v54 = vmul.f32 0.6931472, %v775_v52 }
  0xbb   : > { %v779_v55 = vpop.eup %778  ;;  %v312_v56 = vmul.f32 0.6931472, %v777_v53  ;;  %v353_v53 = vmax.f32 %v352_v44, 0.0 }
  0xbc   : > { %v260_v57 = vand.u32 2147483647, %v259_v54  ;;  %v365_v58 = vmul.f32 0.6931472, %v779_v55 }
  0xbd   : > { %v313_v59 = vand.u32 2147483647, %v312_v56 }
  0xbe   : > { %v261_v60 = vadd.f32 1e-06, %v260_v57  ;;  %v366_v61 = vand.u32 2147483647, %v365_v58  ;;  %v301_v58 = vadd.f32 1e-05, %v300_v50 }
  0xbf   : > { %v314_v63 = vadd.f32 1e-06, %v313_v59 }
  0xc0   : > { %780 = vrcp.f32 %v261_v60  ;;  %v367_v0 = vadd.f32 1e-06, %v366_v61  ;;  %v354_v60 = vadd.f32 1e-05, %v353_v53 }
  0xc1   : > { %782 = vrcp.f32 %v314_v63 }
  0xc2   : > { %784 = vrcp.f32 %v367_v0 }
  0xc3   : > { %786 = vrsqrt.f32 %v248_v49 }
  0xcd   : > { %v781_v3 = vpop.eup %780 }
  0xce   : > { %v783_v21 = vpop.eup %782  ;;  %v265_v22 = vsel %vm264_vm1, %v781_v3, 0.0 }
  0xcf   : > { %v785_v25 = vpop.eup %784  ;;  %v266_v26 = vrot.slane %v265_v22, 4  ;;  %v317_v8 = vsel %vm264_vm1, %v783_v21, 0.0 }
  0xd0   : > { %v318_v28 = vrot.slane %v317_v8, 4  ;;  %v370_v29 = vsel %vm264_vm1, %v785_v25, 0.0  ;;  %v787_v61 = vpop.eup %786 }
  0xd1   : > { %v267_v30 = vadd.f32 %v266_v26, %v265_v22  ;;  %v371_v38 = vrot.slane %v370_v29, 4 }
  0xd2   : > { %v319_v39 = vadd.f32 %v318_v28, %v317_v8 }
  0xd3   : > { %v268_v42 = vrot.slane %v267_v30, 2  ;;  %v372_v43 = vadd.f32 %v371_v38, %v370_v29 }
  0xd4   : > { %v320_v45 = vrot.slane %v319_v39, 2 }
  0xd5   : > { %v269_v46 = vadd.f32 %v268_v42, %v267_v30  ;;  %v373_v47 = vrot.slane %v372_v43, 2 }
  0xd6   : > { %v321_v48 = vadd.f32 %v320_v45, %v319_v39 }
  0xd7   : > { %v270_v51 = vrot.slane %v269_v46, 1  ;;  %v374_v52 = vadd.f32 %v373_v47, %v372_v43 }
  0xd8   : > { %v322_v54 = vrot.slane %v321_v48, 1 }
  0xd9   : > { %v271_v55 = vadd.f32 %v270_v51, %v269_v46  ;;  %v375_v56 = vrot.slane %v374_v52, 1 }
  0xda   : > { %v323_v57 = vadd.f32 %v322_v54, %v321_v48 }
  0xdb   : > { %788 = vrcp.f32 %v271_v55  ;;  %v376_v59 = vadd.f32 %v375_v56, %v374_v52 }
  0xdc   : > { %790 = vrcp.f32 %v323_v57 }
  0xdd   : > { %792 = vrcp.f32 %v376_v59 }
  0xde   : > { %794 = vrsqrt.f32 %v301_v58 }
  0xdf   : > { %796 = vrsqrt.f32 %v354_v60 }
  0xe8   : > { %v789_v62 = vpop.eup %788 }
  0xe9   : > { %v791_v63 = vpop.eup %790  ;;  %v274_v0 = vmul.f32 %v789_v62, %v781_v3 }
  0xea   : > { %v793_v2 = vpop.eup %792  ;;  %v326_v4 = vmul.f32 %v791_v63, %v783_v21 }
  0xeb   : > { %v795_v5 = vpop.eup %794  ;;  %v275_v7 = vmul.f32 %v787_v61, %v274_v0  ;;  %v379_v9 = vmul.f32 %v793_v2, %v785_v25 }
  0xec   : > { %v797_v10 = vpop.eup %796  ;;  %v327_v12 = vmul.f32 %v795_v5, %v326_v4 }
  0xed   : > { %v380_v6 = vmul.f32 %v797_v10, %v379_v9  ;;  %v400_v14 = vmul.f32 %v398_v35, %v275_v7  ;;  %v429_v35 = vld [vmem:[%s1177_s1 + $0x8] sm:$0xff] }
  0xee   : > { %v410_v15 = vmul.f32 %v408_v36, %v327_v12  ;;  %v431_v36 = vld [vmem:[%s1177_s1 + $0x18] sm:$0xff] }
  0xef   : > { %v401_v16 = vmul.f32 %v400_v14, %v1082_v1  ;;  %403 = vst [vmem:[#allocation2 + $0xf] sm:$0x1f] %v400_v14  ;;  %v420_v17 = vmul.f32 %v418_v37, %v380_v6 }
  0xf0   : > { %v411_v18 = vmul.f32 %v410_v15, %v1092_v11  ;;  %413 = vst [vmem:[#allocation2 + $0x14] sm:$0x1f] %v410_v15 }
  0xf1   : > { %402 = vst [vmem:[#allocation2] sm:$0x1f] %v401_v16  ;;  %v421_v19 = vmul.f32 %v420_v17, %v1097_v13  ;;  %423 = vst [vmem:[#allocation2 + $0x19] sm:$0x1f] %v420_v17 }
  0xf2   : > { %412 = vst [vmem:[#allocation2 + $0x5] sm:$0x1f] %v411_v18 }
  0xf3   : > { %422 = vst [vmem:[#allocation2 + $0xa] sm:$0x1f] %v421_v19 }
  0xf7   : > { %v434_v33 = vld [vmem:[#allocation2 + $0x10] sm:$0xff] }
  0xf8   : > { %v435_v32 = vld [vmem:[#allocation2 + $0x18] sm:$0xff] }
  0xf9   : > { %668 = vmatprep.subr.mxu0 %v435_v32  ;;  %683 = vmatprep.subr.mxu1 %v435_v32  ;;  %v432_v34 = vld [vmem:[#allocation2] sm:$0xff] }
  0xfa   : > { %669 = vmatpush3.msra.mxu0 %v435_v32  ;;  %688 = vmatpush3.msra.mxu1 %v435_v32  ;;  %v433_v31 = vld [vmem:[#allocation2 + $0x8] sm:$0xff] }
  0xfb   : > { %670 = vmatprep.subr.mxu0 %v434_v33  ;;  %684 = vmatprep.subr.mxu1 %v434_v33 }
  0xfc   : > { %671 = vmatpush3.msra.mxu0 %v434_v33  ;;  %689 = vmatpush3.msra.mxu1 %v434_v33 }
  0xfd   : > { %672 = vmatprep.subr.mxu0 %v433_v31  ;;  %685 = vmatprep.subr.mxu1 %v433_v31 }
  0xfe   : > { %673 = vmatpush3.msra.mxu0 %v433_v31  ;;  %690 = vmatpush3.msra.mxu1 %v433_v31 }
  0xff   : > { %674 = vmatprep.subr.mxu0 %v432_v34  ;;  %686 = vmatprep.subr.mxu1 %v432_v34 }
 0x100   : > { %675 = vmatpush3.msra.mxu0 %v432_v34  ;;  %691 = vmatpush3.msra.mxu1 %v432_v34 }
 0x101   : > { %677 = vmatmul.mubr.msk.f32.vlgmr.msra.gmra.mxu0 %vm437_vm0, %v429_v35  ;;  %680 = vmatmul.mubr.msk.f32.vlgmr.msra.gmra.mxu1 %vm437_vm0, %v431_v36 }
 0x1c1   : > { %v678_v37 = vpop.f32.mrf.mxu0  ;;  %v681_v1 = vpop.f32.mrf.mxu1 }
 0x1c2   : > { %536 = vst [vmem:[%s199_s29 + $0x8] sm:$0xff] %v678_v37  ;;  %538 = vst [vmem:[%s199_s29 + $0x18] sm:$0xff] %v681_v1 }
 0x1c3   : > { %v516_v11 = vpop.f32.mrf.mxu0  ;;  %v526_v13 = vpop.f32.mrf.mxu1 }
 0x1c4   : > { %535 = vst [vmem:[%s199_s29] sm:$0xff] %v516_v11  ;;  %537 = vst [vmem:[%s199_s29 + $0x10] sm:$0xff] %v526_v13 }
 0x1c5   : > { %839 = shalt.err (!%p836_p3)
}
 0x1c6   : > { %s840_s11 = scalar_lea.hbm %s1129_s24, 512  ;;  %s844_s22 = scalar_lea.hbm %s1179_s3, 4096 }
 0x1c7   : > { %p841_p5 = scmp.ne.s32.totalorder %s1129_s24, %s840_s11  ;;  %p845_p10 = scmp.lt.s32.totalorder %s1129_s24, %s1179_s3 }
 0x1c8   : > { %p846_p4 = scmp.lt.s32.totalorder %s844_s22, %s840_s11 }
 0x1c9   : > { %p842_p6 = pnand %p841_p5, %p985_p9 }
 0x1ca   : > { %p847_p12 = por %p846_p4, %p845_p10 }
 0x1cb   : > { %p843_p7 = pneg %p842_p6 }
 0x1cd   : > { %p848_p8 = pnand %p847_p12, %p843_p7 }
 0x1cf   : > { %851 = shalt.err (!%p848_p8)
}
 0x1d0   : > { %s912_s29 = smov 128   ;;  %s913_s4 = smov 8  }
 0x1d1   : > { %694 = dma.vmem_to_hbm [thread:$0]  (%p985_p9), %s1124_s30, 512, %s1129_s24, %s540_s7, %s912_s29, %s912_s29, %s913_s4  }
 0x1d2 PF: > { %p705_p11 = scmp.ge.s32.totalorder %s906_s17, 2  ;;  %s569_s5 = sand.u32 1, %s886_s12  }
 0x1d3   : > { %p1185_p13 = scmp.ne.s32.totalorder %s1183_s27, 0  ;;  %s570_s6 = scalar_lea.sflag [#allocation5], %s569_s5 }
 0x1d5   : > { %p701_p0 = pnand %p705_p11, %p1185_p13 }
 0x1d7   : > { %p702_p1 = pneg %p701_p0 }
 0x1d9   : > { %881 = dma.done.wait (%p702_p1), %s570_s6, 512  }
 0x1da   : > { %883 = vsyncadd (%p702_p1), %s570_s6, 4294966784  ;;  %s19_s17 = sadd.s32 1, %s906_s17   ;;  %s1186_s12 = smov %s890_s13 }
 0x1db   : > { %p16_p2 = scmp.ge.s32.totalorder %s19_s17, 10   ;;  %s1187_s13 = smov %s894_s14 }
 0x1dc   : > { %s1188_s14 = smov %s990_s26  ;;  %s1189_s15 = smov %s902_s16 }
 0x1dd   : > { %s1190_s16 = smov %s1192_s20  ;;  %18 = sbr.rel (!%p16_p2) target bundleno = 6 (0x6), region = 80 }
 0x1e2   :  { %575 = vsyncpa [#allocation4], 1 }
 0x1e3   :  { %577 = vsyncpa [#allocation4 + $0x1], 1 }
 0x1e4   :  { %578 = vsyncpa [#allocation5], 1 }
 0x1e5   :  { %580 = vsyncpa [#allocation5 + $0x1], 1 }

</bundles_post_ra>
